<compile_context>
chip_gen: v7x
topology: tpu7x:2x2x1
jax: 0.10.0
libtpu: 0.0.40
codegen_flags: <defaults>
</compile_context>

<pallas_src>
import jax
import jax.numpy as jnp
from jax.experimental import pallas as pl
from jax.experimental.pallas import tpu as pltpu


_VMEM_LIMIT_BYTES = 48 * 1024 * 1024   # < v7x 64 MiB physical; plenty on v5e/v6e
_VMEM_BUDGET_BYTES = 36 * 1024 * 1024  # what block sizing is allowed to consume
_MAX_X_BLOCK_BYTES = 8 * 1024 * 1024   # per-module (TR, HW) block target


# ---------------------------------------------------------------------------
# Pallas kernel: per-row affine on M lane-dense (TR, HW) tiles in one call.
# ---------------------------------------------------------------------------
def _make_rows_affine_kernel(m):
    """Ref layout: x_0..x_{m-1}, p_0..p_{m-1}, y_0..y_{m-1}.

    x_i: (TR, HW) native dtype   streamed tile of flattened rows
    p_i: (TR, 2)  float32        col 0 = per-row scale, col 1 = per-row shift
    y_i: (TR, HW) native dtype
    """
    def kernel(*refs):
        x_refs = refs[:m]
        p_refs = refs[m:2 * m]
        y_refs = refs[2 * m:3 * m]
        for i in range(m):                               # m is small & static
            x = x_refs[i][...].astype(jnp.float32)       # in-kernel upcast (v5e: no bf16 VALU)
            p = p_refs[i][...]
            scale = p[:, 0:1]
            shift = p[:, 1:2]
            y_refs[i][...] = (x * scale + shift).astype(y_refs[i].dtype)
    return kernel


def _pick_block_rows(r, hw, itemsize, m):
    """Rows per tile.

    Accounts for: x+y double-buffered per module plus the lane-padded
    (TR, 2)->(TR, 128) f32 param block (double-buffered), a per-block ~8 MiB
    cap, dtype sublane packing, and a v7x preference for >= 2 grid steps so the
    "parallel" row axis shards across both TensorCores.
    """
    sub = max(8, 32 // itemsize)                 # 8 for f32, 16 for bf16, 32 for int8
    per_row = 4 * hw * itemsize + 2 * 128 * 4    # x+y (x2 buffers) + padded params (x2 buffers)
    budget = _VMEM_BUDGET_BYTES // max(m, 1)
    cap_rows = max(sub, budget // max(per_row, 1))
    cap_rows = min(cap_rows, max(sub, _MAX_X_BLOCK_BYTES // max(hw * itemsize, 1)))
    tr = min(r, cap_rows)
    if tr >= r and r > sub:
        half = (r + 1) // 2
        half = ((half + sub - 1) // sub) * sub   # round up to sublane multiple
        tr = min(tr, half)
    if tr >= sub:
        tr = (tr // sub) * sub                   # keep (8,128) divisibility
    return max(1, min(tr, r))


def _rows_affine_fused(xs_2d, params_2d, out_dtypes, *, block_rows=None, donate=False):
    """One pallas_call over M same-shape (R, HW) arrays with per-row affine params."""
    m = len(xs_2d)
    r, hw = xs_2d[0].shape
    itemsize = jnp.dtype(xs_2d[0].dtype).itemsize
    tr = int(block_rows) if block_rows is not None else _pick_block_rows(r, hw, itemsize, m)
    tr = min(tr, r)
    grid = (pl.cdiv(r, tr),)

    x_spec = pl.BlockSpec((tr, hw), lambda i: (i, 0))
    p_spec = pl.BlockSpec((tr, 2), lambda i: (i, 0))
    y_spec = pl.BlockSpec((tr, hw), lambda i: (i, 0))

    in_specs = [x_spec] * m + [p_spec] * m
    out_specs = tuple([y_spec] * m)
    out_shape = tuple(jax.ShapeDtypeStruct((r, hw), dt) for dt in out_dtypes)

    io_bytes = 2 * sum(x.size * jnp.dtype(x.dtype).itemsize for x in xs_2d)
    io_bytes += sum(p.size * 4 for p in params_2d)
    cost = pl.CostEstimate(flops=2 * m * r * hw, transcendentals=0,
                           bytes_accessed=io_bytes)

    # Optional: alias x_i -> y_i when the caller no longer needs x (flow inference).
    aliases = {i: i for i in range(m)} if donate else {}

    ys = pl.pallas_call(
        _make_rows_affine_kernel(m),
        out_shape=out_shape,
        grid=grid,
        in_specs=in_specs,
        out_specs=out_specs,
        input_output_aliases=aliases,
        cost_estimate=cost,
        compiler_params=pltpu.CompilerParams(
            dimension_semantics=("parallel",),
            vmem_limit_bytes=_VMEM_LIMIT_BYTES,
        ),
    )(*xs_2d, *params_2d)
    return list(ys)


# ---------------------------------------------------------------------------
# Fused forward/invert over the whole module list.
# ---------------------------------------------------------------------------
def _module_scale_shift(logscale, shift, invert):
    ls = logscale.astype(jnp.float32)
    sh = shift.astype(jnp.float32)
    if invert:
        scale = jnp.exp(-ls)                 # exp hoisted out of the kernel
        shf = -sh * scale
    else:
        scale = jnp.exp(ls)
        shf = sh
    return scale, shf


def _params_rows(scale_c, shift_c, n, c):
    # Broadcast per-channel (C,) params to per-row (N*C, 2).  Tiny (<= a few KiB).
    scale_rows = jnp.broadcast_to(scale_c[None, :], (n, c)).reshape(n * c)
    shift_rows = jnp.broadcast_to(shift_c[None, :], (n, c)).reshape(n * c)
    return jnp.stack([scale_rows, shift_rows], axis=-1)   # (N*C, 2) f32


def _fused_channel_affine(xs, logscales, shifts, *, invert=False,
                          block_rows=None, donate=False):
    """Apply M per-channel affine modifiers (one per input).

    Same-shape/dtype inputs are fused into ONE pallas_call with M in/out ref
    pairs (no stack/unstack copies).  Mismatched inputs dispatch per module,
    matching ModifyList's zip semantics.  Returns (ys tuple, logdet (N,)).
    """
    # logdet depends only on the coefficients (per module: H*W * sum_c logscale,
    # identical for every sample); summed over modules in plain JAX (tiny).
    n0 = xs[0].shape[0]
    sign = jnp.float32(-1.0 if invert else 1.0)
    ld = jnp.zeros((), jnp.float32)
    for x, ls in zip(xs, logscales):
        hw = x.shape[2] * x.shape[3]
        ld = ld + jnp.float32(hw) * jnp.sum(ls.astype(jnp.float32))
    logdet = jnp.full((n0,), sign * ld, dtype=jnp.float32)

    shapes = {tuple(x.shape) for x in xs}
    dtypes = {jnp.dtype(x.dtype) for x in xs}

    if len(shapes) == 1 and len(dtypes) == 1:
        # Single fused pallas_call; reshapes to (N*C, HW) are copy-free.
        # TODO(synk): for production shapes where H*W is not a multiple of 128,
        # re-flatten so the lane dim is lane-dense (e.g. (C, N*H*W)) instead of
        # relying on the full-dim exception.
        n, c, h, w = xs[0].shape
        hw = h * w
        xs_2d = [x.reshape(n * c, hw) for x in xs]
        params = []
        for ls, sh in zip(logscales, shifts):
            scale_c, shift_c = _module_scale_shift(ls, sh, invert)
            params.append(_params_rows(scale_c, shift_c, n, c))
        ys_2d = _rows_affine_fused(xs_2d, params, [x.dtype for x in xs],
                                   block_rows=block_rows, donate=donate)
        ys = tuple(y.reshape(n, c, h, w) for y in ys_2d)
    else:
        # Per-module fallback (different shapes/dtypes).
        ys = []
        for x, ls, sh in zip(xs, logscales, shifts):
            n, c, h, w = x.shape
            scale_c, shift_c = _module_scale_shift(ls, sh, invert)
            p = _params_rows(scale_c, shift_c, n, c)
            (y2,) = _rows_affine_fused([x.reshape(n * c, h * w)], [p], [x.dtype],
                                       block_rows=block_rows, donate=donate)
            ys.append(y2.reshape(n, c, h, w))
        ys = tuple(ys)

    return ys, logdet


# ---------------------------------------------------------------------------
# Module-level API mirroring the PyTorch ModifyList.
# ---------------------------------------------------------------------------
class ChannelAffineModifier:
    """Invertible modifier m(x, c): c has shape (2, C) = [logscale; shift]."""

    def __call__(self, x, c, fixed=None):
        (y,), logdet = _fused_channel_affine([x], [c[0]], [c[1]])
        return y, logdet

    def invert(self, y, c, fixed=None):
        (x,), logdet = _fused_channel_affine([y], [c[0]], [c[1]], invert=True)
        return x, logdet


class ModifyListPallas:
    """Apply different modifiers to different inputs (Pallas port of ModifyList)."""

    def __init__(self, *modifiers):
        self.modifiers = list(modifiers)

    def forward(self, xs, coefs, fixed=None, block_rows=None, donate=False):
        assert len(xs) == len(coefs) == len(self.modifiers), (
            f"{len(xs)} xs and {len(self.modifiers)} modules")
        return _fused_channel_affine(
            list(xs), [c[0] for c in coefs], [c[1] for c in coefs],
            block_rows=block_rows, donate=donate)

    def invert(self, ys, coefs, fixed=None, block_rows=None, donate=False):
        assert len(ys) == len(coefs) == len(self.modifiers), (
            f"{len(ys)} ys and {len(self.modifiers)} modules")
        return _fused_channel_affine(
            list(ys), [c[0] for c in coefs], [c[1] for c in coefs],
            invert=True, block_rows=block_rows, donate=donate)


# ---------------------------------------------------------------------------
# Demo / correctness check.
# ---------------------------------------------------------------------------
if __name__ == "__main__":
    key = jax.random.PRNGKey(0)
    k1, k2, k3 = jax.random.split(key, 3)

    N, C, H, W = 4, 8, 16, 16          # HW = 256 (lane-dense), R = N*C = 32 rows
    x0 = jax.random.normal(k1, (N, C, H, W), dtype=jnp.float32)
    x1 = jax.random.normal(k2, (N, C, H, W), dtype=jnp.float32)

    # Deterministic per-module coefficients: (2, C) = [logscale; shift].
    c0 = jnp.stack([jnp.linspace(-0.1, 0.1, C, dtype=jnp.float32),
                    jnp.linspace(0.0, 0.3, C, dtype=jnp.float32)])
    c1 = jnp.stack([jnp.linspace(0.05, -0.05, C, dtype=jnp.float32),
                    jnp.linspace(-0.2, 0.2, C, dtype=jnp.float32)])

    model = ModifyListPallas(ChannelAffineModifier(), ChannelAffineModifier())

    def ref_one(x, c):
        ls, sh = c[0].astype(jnp.float32), c[1].astype(jnp.float32)
        xf = x.astype(jnp.float32)
        y = xf * jnp.exp(ls)[None, :, None, None] + sh[None, :, None, None]
        hw = x.shape[2] * x.shape[3]
        ld = jnp.full((x.shape[0],), jnp.sum(ls) * hw, dtype=jnp.float32)
        return y, ld

    ry0, rl0 = ref_one(x0, c0)
    ry1, rl1 = ref_one(x1, c1)

    # --- fused f32 path (auto block sizing -> >= 2 grid steps) ---
    (y0, y1), logdet = model.forward([x0, x1], [c0, c1])
    jax.block_until_ready((y0, y1, logdet))
    assert y0.dtype == x0.dtype and y1.dtype == x1.dtype
    assert y0.shape == (N, C, H, W) and logdet.shape == (N,)
    assert jnp.allclose(y0, ry0, atol=1e-5)
    assert jnp.allclose(y1, ry1, atol=1e-5)
    assert jnp.allclose(logdet, rl0 + rl1, atol=1e-4)

    # --- explicit small block: 4-step pipelined grid, identical results ---
    (y0_t, y1_t), logdet_t = model.forward([x0, x1], [c0, c1], block_rows=8)
    jax.block_until_ready((y0_t, y1_t, logdet_t))
    assert jnp.allclose(y0_t, ry0, atol=1e-5)
    assert jnp.allclose(y1_t, ry1, atol=1e-5)
    assert jnp.allclose(logdet_t, rl0 + rl1, atol=1e-4)

    # --- invert round-trip through the same kernel ---
    (x0_rec, x1_rec), logdet_inv = model.invert([y0, y1], [c0, c1])
    jax.block_until_ready((x0_rec, x1_rec, logdet_inv))
    assert jnp.allclose(x0_rec, x0, atol=1e-5)
    assert jnp.allclose(x1_rec, x1, atol=1e-5)
    assert jnp.allclose(logdet + logdet_inv, jnp.zeros_like(logdet), atol=1e-4)

    # --- bf16 I/O stays bf16 (compute upcast to f32 inside the kernel) ---
    x0b, x1b = x0.astype(jnp.bfloat16), x1.astype(jnp.bfloat16)
    (y0b, y1b), logdet_b = model.forward([x0b, x1b], [c0, c1])
    jax.block_until_ready((y0b, y1b, logdet_b))
    assert y0b.dtype == jnp.bfloat16 and y1b.dtype == jnp.bfloat16
    ry0b, _ = ref_one(x0b, c0)
    ry1b, _ = ref_one(x1b, c1)
    assert jnp.allclose(y0b.astype(jnp.float32), ry0b, atol=5e-2, rtol=2e-2)
    assert jnp.allclose(y1b.astype(jnp.float32), ry1b, atol=5e-2, rtol=2e-2)
    assert jnp.allclose(logdet_b, rl0 + rl1, atol=1e-4)

    # --- mismatched shapes fall back to per-module calls (ModifyList zip semantics) ---
    x2 = jax.random.normal(k3, (N, C, 8, 16), dtype=jnp.float32)   # HW = 128
    (z0, z2), logdet_mm = model.forward([x0, x2], [c0, c1])
    jax.block_until_ready((z0, z2, logdet_mm))
    rz2, rl2 = ref_one(x2, c1)
    assert jnp.allclose(z0, ry0, atol=1e-5)
    assert jnp.allclose(z2, rz2, atol=1e-5)
    assert jnp.allclose(logdet_mm, rl0 + rl2, atol=1e-4)

    print("KERNEL_OK")
</pallas_src>

<mosaic_0001>
module attributes {stable_mosaic.version = 11 : i64} {
  func.func @kernel(%arg0: i32, %arg1: memref<16x256xf32, #tpu.memory_space<vmem>>, %arg2: memref<16x256xf32, #tpu.memory_space<vmem>>, %arg3: memref<16x2xf32, #tpu.memory_space<vmem>>, %arg4: memref<16x2xf32, #tpu.memory_space<vmem>>, %arg5: memref<16x256xf32, #tpu.memory_space<vmem>>, %arg6: memref<16x256xf32, #tpu.memory_space<vmem>>) attributes {dimension_semantics = [#tpu.dimension_semantics<parallel>], iteration_bounds = array<i64: 2>, scalar_prefetch = 0 : i64, scratch_operands = 0 : i64, tpu.core_type = #tpu.core_type<tc>, window_params = [{transform_indices = @transform_0, window_bounds = array<i64: 16, 256>}, {transform_indices = @transform_1, window_bounds = array<i64: 16, 256>}, {transform_indices = @transform_2, window_bounds = array<i64: 16, 2>}, {transform_indices = @transform_3, window_bounds = array<i64: 16, 2>}, {transform_indices = @transform_4, window_bounds = array<i64: 16, 256>}, {transform_indices = @transform_5, window_bounds = array<i64: 16, 256>}]} {
    %c0 = arith.constant 0 : index
    %c0_0 = arith.constant 0 : index
    %0 = vector.load %arg1[%c0, %c0_0] : memref<16x256xf32, #tpu.memory_space<vmem>>, vector<16x256xf32>
    %c0_1 = arith.constant 0 : index
    %c0_2 = arith.constant 0 : index
    %1 = vector.load %arg3[%c0_1, %c0_2] : memref<16x2xf32, #tpu.memory_space<vmem>>, vector<16x2xf32>
    %2 = vector.extract_strided_slice %1 {offsets = [0, 0], sizes = [16, 1], strides = [1, 1]} : vector<16x2xf32> to vector<16x1xf32>
    %3 = vector.extract_strided_slice %1 {offsets = [0, 1], sizes = [16, 1], strides = [1, 1]} : vector<16x2xf32> to vector<16x1xf32>
    %4 = vector.broadcast %2 : vector<16x1xf32> to vector<16x256xf32>
    %5 = arith.mulf %0, %4 : vector<16x256xf32>
    %6 = vector.broadcast %3 : vector<16x1xf32> to vector<16x256xf32>
    %7 = arith.addf %5, %6 : vector<16x256xf32>
    %c0_3 = arith.constant 0 : index
    %c0_4 = arith.constant 0 : index
    %8 = vector.load %arg5[%c0_3, %c0_4] : memref<16x256xf32, #tpu.memory_space<vmem>>, vector<16x256xf32>
    tpu.vector_store %arg5[%c0_3, %c0_4], %7 {strides = array<i32>} : memref<16x256xf32, #tpu.memory_space<vmem>>, vector<16x256xf32>,
    %c0_5 = arith.constant 0 : index
    %c0_6 = arith.constant 0 : index
    %9 = vector.load %arg2[%c0_5, %c0_6] : memref<16x256xf32, #tpu.memory_space<vmem>>, vector<16x256xf32>
    %c0_7 = arith.constant 0 : index
    %c0_8 = arith.constant 0 : index
    %10 = vector.load %arg4[%c0_7, %c0_8] : memref<16x2xf32, #tpu.memory_space<vmem>>, vector<16x2xf32>
    %11 = vector.extract_strided_slice %10 {offsets = [0, 0], sizes = [16, 1], strides = [1, 1]} : vector<16x2xf32> to vector<16x1xf32>
    %12 = vector.extract_strided_slice %10 {offsets = [0, 1], sizes = [16, 1], strides = [1, 1]} : vector<16x2xf32> to vector<16x1xf32>
    %13 = vector.broadcast %11 : vector<16x1xf32> to vector<16x256xf32>
    %14 = arith.mulf %9, %13 : vector<16x256xf32>
    %15 = vector.broadcast %12 : vector<16x1xf32> to vector<16x256xf32>
    %16 = arith.addf %14, %15 : vector<16x256xf32>
    %c0_9 = arith.constant 0 : index
    %c0_10 = arith.constant 0 : index
    %17 = vector.load %arg6[%c0_9, %c0_10] : memref<16x256xf32, #tpu.memory_space<vmem>>, vector<16x256xf32>
    tpu.vector_store %arg6[%c0_9, %c0_10], %16 {strides = array<i32>} : memref<16x256xf32, #tpu.memory_space<vmem>>, vector<16x256xf32>,
    return
  }
  func.func @transform_0(%arg0: i32) -> (i32, i32) {
    %c0_i32 = arith.constant 0 : i32
    %c0_i32_0 = arith.constant 0 : i32
    return %arg0, %c0_i32 : i32, i32
  }
  func.func @transform_1(%arg0: i32) -> (i32, i32) {
    %c0_i32 = arith.constant 0 : i32
    %c0_i32_0 = arith.constant 0 : i32
    return %arg0, %c0_i32 : i32, i32
  }
  func.func @transform_2(%arg0: i32) -> (i32, i32) {
    %c0_i32 = arith.constant 0 : i32
    %c0_i32_0 = arith.constant 0 : i32
    return %arg0, %c0_i32 : i32, i32
  }
  func.func @transform_3(%arg0: i32) -> (i32, i32) {
    %c0_i32 = arith.constant 0 : i32
    %c0_i32_0 = arith.constant 0 : i32
    return %arg0, %c0_i32 : i32, i32
  }
  func.func @transform_4(%arg0: i32) -> (i32, i32) {
    %c0_i32 = arith.constant 0 : i32
    %c0_i32_0 = arith.constant 0 : i32
    return %arg0, %c0_i32 : i32, i32
  }
  func.func @transform_5(%arg0: i32) -> (i32, i32) {
    %c0_i32 = arith.constant 0 : i32
    %c0_i32_0 = arith.constant 0 : i32
    return %arg0, %c0_i32 : i32, i32
  }
}

</mosaic_0001>

<bundles_post_ra>
// kernel: tpu_custom_call.1
= control target key start
LH: loop header
LB: loop body
LE: loop exit
PB: predicated region body
PF: predicated region fallthrough
CT: control target
= control target key end

     0   :  { %11 = vsyncpa [#allocation3], 0  ;;  %s1073_s0 = inlined_call_operand.vmem [shape: f32[32,256], index: 0, kind: input, shape index: {}]   ;;  %s1074_s1 = inlined_call_operand.hbm [shape: f32[32,256], index: 1, kind: input, shape index: {}]   ;;  %s1075_s2 = inlined_call_operand.vmem [shape: f32[32,2], index: 2, kind: input, shape index: {}]   ;;  %s1076_s3 = inlined_call_operand.vmem [shape: f32[32,2], index: 3, kind: input, shape index: {}]   ;;  %s1077_s4 = inlined_call_operand.hbm [shape: f32[32,256], index: 4, kind: output, shape index: {0}]   ;;  %s1078_s5 = inlined_call_operand.hbm [shape: f32[32,256], index: 5, kind: output, shape index: {1}]  }
   0x1   :  { %13 = vsyncpa [#allocation3 + $0x1], 0 }
   0x2   :  { %14 = vsyncpa [#allocation4], 0 }
   0x3   :  { %16 = vsyncpa [#allocation4 + $0x1], 0 }
   0x4   :  { %17 = vsyncpa [#allocation7], 0 }
   0x5   :  { %19 = vsyncpa [#allocation7 + $0x1], 0  ;;  %s842_s18 = smov 0   ;;  %s844_s19 = smov 0  }
   0x6   :  { %s846_s20 = smov 0   ;;  %s848_s21 = smov 0  }
   0x7 LB: > { %s863_s22 = sadd.s32 4294967295, %s801_s21   ;;  %s577_s23 = sadd.s32 4294967294, %s801_s21   ;;  %s801_s21 = sphi %s848_s21, %s1091_s21   ;;  %s797_s20 = sphi %s846_s20, %s1090_s20   ;;  %s793_s19 = sphi %s844_s19, %s1089_s19   ;;  %s789_s18 = sphi %s842_s18, %s1088_s18  }
   0x8   : > { %s867_s24 = sadd.s32 1, %s801_s21   ;;  %s58_s25 = sadd.s32 1, %s797_s20 }
   0x9   : > { %s55_s26 = ssub.s32 %s801_s21, %s867_s24  ;;  %p65_p0 = scmp.ne.s32.totalorder %s797_s20, %s793_s19 }
   0xa   : > { %p56_p1 = scmp.eq.s32.totalorder %s55_s26, 0  ;;  %p66_p2 = scmp.eq.s32.totalorder %s801_s21, 0 }
   0xb   : > { %p71_p3 = scmp.ne.s32.totalorder %s793_s19, %s789_s18  ;;  %p72_p4 = scmp.eq.s32.totalorder %s863_s22, 0 }
   0xc   : > { %s879_s27 = scalar_select %p56_p1, %s797_s20, %s58_s25  }
   0xd   : > { %p881_p5 = por %p66_p2, %p65_p0  ;;  %p885_p6 = por %p72_p4, %p71_p3 }
   0xe   : > { %p147_p7 = scmp.eq.s32.totalorder %s863_s22, 1  ;;  %p153_p8 = scmp.eq.s32.totalorder %s577_s23, 1 }
   0xf   : > { %p629_p10 = scmp.lt.s32.totalorder %s801_s21, 2  ;;  %s209_s7 = sand.u32 1, %s797_s20  }
  0x10   : > { %p892_p11 = por %p147_p7, %p65_p0  ;;  %p896_p12 = por %p153_p8, %p71_p3 }
  0x11   : > { %s606_s8 = sshll.u32 %s801_s21, 9  ;;  %s580_s9 = sshll.u32 %s209_s7, 5 }
  0x12   : > { %s1082_s30 = scalar_select %p892_p11, 1, 0 }
  0x13   : > { %s1083_s6 = scalar_select %p896_p12, 1, 0 }
  0x14   : > { %s905_s12 = scalar_lea.hbm %s1074_s1, %s606_s8  ;;  %s213_s13 = scalar_lea.vmem [#allocation2], %s580_s9 }
  0x15   : > { %s221_s14 = sshll.u32 %s213_s13, 4  ;;  %p909_p13 = pnand %p629_p10, %p881_p5  ;;  %s913_s14 = int_to_ptr.vmem [resolvable:$true] %s221_s14 }
  0x16   : > { %s915_s16 = scalar_lea.sflag [#allocation3], %s209_s7  ;;  %s673_s17 = scalar_lea.hbm %s905_s12, 512 }
  0x17   : > { %p674_p0 = scmp.ne.s32.totalorder %s905_s12, %s673_s17  ;;  %p675_p1 = pneg %p909_p13 }
  0x18   : > { %s678_s26 = scalar_lea.hbm %s1074_s1, 1024  ;;  %p679_p4 = scmp.lt.u32.totalorder %s905_s12, %s1074_s1 }
  0x19   : > { %p676_p2 = pnand %p675_p1, %p674_p0  ;;  %p680_p5 = scmp.lt.u32.totalorder %s678_s26, %s673_s17 }
  0x1a   : > { %p682_p8 = scmp.lt.u32.totalorder %s673_s17, %s905_s12 }
  0x1b   : > { %p677_p3 = pneg %p676_p2  ;;  %p681_p7 = por %p680_p5, %p679_p4 }
  0x1d   : > { %p683_p10 = por %p682_p8, %p681_p7 }
  0x1f   : > { %p684_p9 = pnand %p683_p10, %p677_p3 }
  0x21   : > { %687 = shalt.err (!%p684_p9)
}
  0x22   : > { %s688_s7 = scalar_lea.vmem %s913_s14, 512  ;;  %s803_s9 = smov [#allocation2]  }
  0x23   : > { %p689_p0 = scmp.ne.s32.totalorder %s913_s14, %s688_s7  ;;  %s693_s10 = sshll.u32 %s803_s9, 4  ;;  %s694_s10 = int_to_ptr.vmem [resolvable:$false] %s693_s10 }
  0x24   : > { %s695_s11 = scalar_lea.vmem %s694_s10, 1024  ;;  %p696_p11 = scmp.lt.s32.totalorder %s913_s14, %s694_s10 }
  0x25   : > { %p691_p2 = pnand %p689_p0, %p675_p1  ;;  %p697_p4 = scmp.lt.s32.totalorder %s695_s11, %s688_s7 }
  0x27   : > { %p692_p12 = pneg %p691_p2  ;;  %p698_p5 = por %p697_p4, %p696_p11 }
  0x29   : > { %p699_p7 = pnand %p698_p5, %p692_p12 }
  0x2b   : > { %702 = shalt.err (!%p699_p7)
}
  0x2c   : > { %s804_s13 = smov 256   ;;  %s805_s17 = smov 16  }
  0x2d   : > { %621 = dma.hbm_to_vmem [thread:$0]  (!%p909_p13), %s905_s12, 512, %s913_s14, %s915_s16, %s804_s13, %s804_s13, %s805_s17  }
  0x2e   : > { %p584_p9 = scmp.ge.s32.totalorder %s801_s21, 1  ;;  %p247_p1 = scmp.lt.s32.totalorder %s801_s21, 3 }
  0x30   : > { %p248_p3 = pnand %p584_p9, %p247_p1 }
  0x31   : > { %s946_s23 = sand.u32 (!%p248_p3), 1, %s793_s19  }
  0x32   : > { %251 = sbr.rel (%p248_p3) target bundleno = 244 (0xf4), region = 36  ;;  %s949_s25 = sshll.u32 (!%p248_p3), %s946_s23, 5 }
  0x33   : > { %s254_s26 = scalar_lea.sflag (!%p248_p3), [#allocation3], %s946_s23  ;;  %s953_s28 = scalar_lea.vmem (!%p248_p3), [#allocation2], %s949_s25 }
  0x39   : > { %776 = dma.done.wait (%p885_p6), %s254_s26, 512  }
  0x3a   : > { %778 = vsyncadd (%p885_p6), %s254_s26, 4294966784  ;;  %s588_s12 = sshll.u32 %s863_s22, 1  ;;  %v806_v0 = vmov 0   ;;  %v807_v5 = vmov 1   ;;  %s297_s26 = scalar_lea.vmem [#allocation5], %s949_s25  ;;  %v363_v14 = vld [vmem:[%s953_s28] sm:$0xff] }
  0x3b   : > { %670 = vset.pattern.permute.xlu1 %v806_v0  ;;  %669 = vset.pattern.permute.xlu0 %v806_v0  ;;  %p306_p11 = scmp.lt.s32.totalorder %s588_s12, 3  ;;  %s975_s15 = scalar_lea.vmem [#allocation6], %s949_s25  ;;  %v364_v19 = vld [vmem:[%s953_s28 + $0x8] sm:$0xff]  ;;  %v365_v20 = vld [vmem:[%s953_s28 + $0x10] sm:$0xff]  ;;  %v366_v21 = vld [vmem:[%s953_s28 + $0x18] sm:$0xff] }
  0x3c   : > { %s436_s16 = sshll.u32 %s975_s15, 4  ;;  %s400_s25 = scalar_lea.sflag [#allocation4], %s946_s23  ;;  %s988_s16 = int_to_ptr.vmem [resolvable:$true] %s436_s16 }
  0x3d   : > { %s1093_s12 = smov (!%p306_p11, %s588_s12), 3  ;;  %p1085_p12 = scmp.ne.s32.totalorder %s1082_s30, 0 }
  0x3e   : > { %s592_s14 = sshll.u32 %s1093_s12, 3  ;;  %s607_s29 = sshll.u32 %s1093_s12, 4 }
  0x3f   : > { %s323_s8 = scalar_lea.vmem %s1076_s3, %s592_s14  ;;  %s317_s10 = scalar_lea.vmem %s1075_s2, %s592_s14 }
  0x40   : > { %v367_v1 = vld [vmem:[%s323_s8] sm:$0xff]  ;;  %v368_v3 = vld [vmem:[%s323_s8 + $0x8] sm:$0xff]  ;;  %s310_s17 = scalar_lea.vmem %s1073_s0, %s607_s29  ;;  %s419_s14 = sshll.u32 %s297_s26, 4  ;;  %s972_s14 = int_to_ptr.vmem [resolvable:$true] %s419_s14 }
  0x41   : > { %v331_v2 = vld [vmem:[%s317_s10] sm:$0xff]  ;;  %371 = vperm.xlu1 %670, %v367_v1   ;;  %v332_v4 = vld [vmem:[%s317_s10 + $0x8] sm:$0xff]  ;;  %v329_v12 = vld [vmem:[%s310_s17 + $0x10] sm:$0xff]  ;;  %s609_s12 = sshll.u32 %s863_s22, 9  ;;  %s703_s28 = scalar_lea.vmem %s972_s14, 512 }
  0x42   : > { %335 = vperm.xlu0 %669, %v331_v2   ;;  %v327_v8 = vld [vmem:[%s310_s17] sm:$0xff]  ;;  %v328_v11 = vld [vmem:[%s310_s17 + $0x8] sm:$0xff]  ;;  %v330_v13 = vld [vmem:[%s310_s17 + $0x18] sm:$0xff]  ;;  %s986_s9 = scalar_lea.hbm %s1077_s4, %s609_s12  ;;  %p704_p6 = scmp.ne.s32.totalorder %s972_s14, %s703_s28 }
  0x43   : > { %s808_s10 = smov [#allocation5]  }
  0x44   : > { %p705_p13 = pnand %p704_p6, %p1085_p12  ;;  %s707_s29 = sshll.u32 %s808_s10, 4  ;;  %s708_s29 = int_to_ptr.vmem [resolvable:$false] %s707_s29 }
  0x45   : > { %376 = vperm.xlu1 %670, %v368_v3   ;;  %s709_s11 = scalar_lea.vmem %s708_s29, 1024  ;;  %p710_p10 = scmp.lt.s32.totalorder %s972_s14, %s708_s29 }
  0x46   : > { %340 = vperm.xlu0 %669, %v332_v4   ;;  %p706_p8 = pneg %p705_p13  ;;  %p711_p0 = scmp.lt.s32.totalorder %s709_s11, %s703_s28 }
  0x48   : > { %p712_p2 = por %p711_p0, %p710_p10 }
  0x49   : > { %672 = vset.pattern.permute.xlu1 %v807_v5 }
  0x4a   : > { %671 = vset.pattern.permute.xlu0 %v807_v5  ;;  %352 = vperm.xlu1 %672, %v332_v4   ;;  %p713_p4 = pnand %p712_p2, %p706_p8 }
  0x4b   : > { %348 = vperm.xlu0 %671, %v331_v2  }
  0x4e   : > { %384 = vperm.xlu1 %672, %v367_v1  }
  0x4f   : > { %388 = vperm.xlu0 %671, %v368_v3  }
  0xc0   : > { %v372_v6 = vpop.permute.xlu1 %371 }
  0xc1   : > { %v336_v7 = vpop.permute.xlu0 %335  ;;  %v379_v28 = vmul.f32 %v372_v6, %v363_v14  ;;  %v380_v29 = vmul.f32 %v372_v6, %v364_v19 }
  0xc2   : > { %v343_v15 = vmul.f32 %v336_v7, %v327_v8  ;;  %v344_v16 = vmul.f32 %v336_v7, %v328_v11 }
  0xc4   : > { %v377_v9 = vpop.permute.xlu1 %376 }
  0xc5   : > { %v341_v10 = vpop.permute.xlu0 %340  ;;  %v381_v30 = vmul.f32 %v377_v9, %v365_v20  ;;  %v382_v31 = vmul.f32 %v377_v9, %v366_v21 }
  0xc6   : > { %v345_v17 = vmul.f32 %v341_v10, %v329_v12  ;;  %v346_v18 = vmul.f32 %v341_v10, %v330_v13 }
  0xc9   : > { %v353_v22 = vpop.permute.xlu1 %352 }
  0xca   : > { %v349_v23 = vpop.permute.xlu0 %348  ;;  %v357_v24 = vadd.f32 %v353_v22, %v345_v17  ;;  %v358_v25 = vadd.f32 %v353_v22, %v346_v18 }
  0xcb   : > { %v355_v26 = vadd.f32 %v349_v23, %v343_v15  ;;  %v356_v27 = vadd.f32 %v349_v23, %v344_v16 }
  0xcc   : > { %361 = vst [vmem:[%s297_s26 + $0x10] sm:$0xff] %v357_v24  ;;  %362 = vst [vmem:[%s297_s26 + $0x18] sm:$0xff] %v358_v25 }
  0xcd   : > { %359 = vst [vmem:[%s297_s26] sm:$0xff] %v355_v26  ;;  %360 = vst [vmem:[%s297_s26 + $0x8] sm:$0xff] %v356_v27  ;;  %v385_v32 = vpop.permute.xlu1 %384 }
  0xce   : > { %v389_v33 = vpop.permute.xlu0 %388 }
  0xcf   : > { %716 = shalt.err (!%p713_p4)
}
  0xd0   : > { %s717_s13 = scalar_lea.hbm %s986_s9, 512  ;;  %s721_s8 = scalar_lea.hbm %s1077_s4, 1024 }
  0xd1   : > { %p718_p5 = scmp.ne.s32.totalorder %s986_s9, %s717_s13  ;;  %p722_p1 = scmp.lt.u32.totalorder %s986_s9, %s1077_s4 }
  0xd2   : > { %p723_p3 = scmp.lt.u32.totalorder %s721_s8, %s717_s13  ;;  %p725_p6 = scmp.lt.u32.totalorder %s717_s13, %s986_s9 }
  0xd3   : > { %p719_p7 = pnand %p718_p5, %p1085_p12 }
  0xd4   : > { %p724_p11 = por %p723_p3, %p722_p1 }
  0xd5   : > { %p720_p9 = pneg %p719_p7 }
  0xd6   : > { %p726_p13 = por %p725_p6, %p724_p11 }
  0xd8   : > { %p727_p8 = pnand %p726_p13, %p720_p9 }
  0xda   : > { %730 = shalt.err (!%p727_p8)
}
  0xdb   : > { %s809_s28 = smov 256   ;;  %s810_s29 = smov 16   ;;  %v391_v34 = vadd.f32 %v385_v32, %v379_v28  ;;  %v392_v35 = vadd.f32 %v385_v32, %v380_v29  ;;  %v393_v36 = vadd.f32 %v389_v33, %v381_v30  ;;  %v394_v37 = vadd.f32 %v389_v33, %v382_v31 }
  0xdc   : > { %614 = dma.vmem_to_hbm [thread:$0]  (%p1085_p12), %s972_s14, 512, %s986_s9, %s400_s25, %s809_s28, %s809_s28, %s810_s29  }
  0xdd   : > { %s1022_s17 = scalar_lea.hbm %s1078_s5, %s609_s12  ;;  %395 = vst [vmem:[%s975_s15] sm:$0xff] %v391_v34  ;;  %396 = vst [vmem:[%s975_s15 + $0x8] sm:$0xff] %v392_v35  ;;  %s405_s26 = scalar_lea.sflag [#allocation7], %s946_s23 }
  0xde   : > { %397 = vst [vmem:[%s975_s15 + $0x10] sm:$0xff] %v393_v36  ;;  %398 = vst [vmem:[%s975_s15 + $0x18] sm:$0xff] %v394_v37  ;;  %s731_s8 = scalar_lea.vmem %s988_s16, 512  ;;  %s811_s14 = smov [#allocation6]  }
  0xdf   : > { %p732_p10 = scmp.ne.s32.totalorder %s988_s16, %s731_s8  ;;  %s735_s9 = sshll.u32 %s811_s14, 4  ;;  %s736_s9 = int_to_ptr.vmem [resolvable:$false] %s735_s9 }
  0xe0   : > { %s737_s25 = scalar_lea.vmem %s736_s9, 1024  ;;  %p738_p4 = scmp.lt.s32.totalorder %s988_s16, %s736_s9 }
  0xe1   : > { %p733_p0 = pnand %p732_p10, %p1085_p12  ;;  %p739_p5 = scmp.lt.s32.totalorder %s737_s25, %s731_s8 }
  0xe3   : > { %p734_p2 = pneg %p733_p0  ;;  %p740_p7 = por %p739_p5, %p738_p4 }
  0xe5   : > { %p741_p9 = pnand %p740_p7, %p734_p2 }
  0xe7   : > { %744 = shalt.err (!%p741_p9)
}
  0xe8   : > { %s745_s22 = scalar_lea.hbm %s1022_s17, 512  ;;  %s749_s7 = scalar_lea.hbm %s1078_s5, 1024 }
  0xe9   : > { %p746_p1 = scmp.ne.s32.totalorder %s1022_s17, %s745_s22  ;;  %p750_p6 = scmp.lt.u32.totalorder %s1022_s17, %s1078_s5 }
  0xea   : > { %p751_p13 = scmp.lt.u32.totalorder %s749_s7, %s745_s22  ;;  %p753_p10 = scmp.lt.u32.totalorder %s745_s22, %s1022_s17 }
  0xeb   : > { %p747_p3 = pnand %p746_p1, %p1085_p12 }
  0xec   : > { %p752_p8 = por %p751_p13, %p750_p6 }
  0xed   : > { %p748_p11 = pneg %p747_p3 }
  0xee   : > { %p754_p0 = por %p753_p10, %p752_p8 }
  0xf0   : > { %p755_p2 = pnand %p754_p0, %p748_p11 }
  0xf2   : > { %758 = shalt.err (!%p755_p2)
}
  0xf3   : > { %615 = dma.vmem_to_hbm [thread:$0]  (%p1085_p12), %s988_s16, 512, %s1022_s17, %s405_s26, %s809_s28, %s809_s28, %s810_s29  }
  0xf4 PF: > { %s451_s13 = sand.u32 1, %s789_s18   ;;  %p1086_p4 = scmp.ne.s32.totalorder %s1083_s6, 0 }
  0xf5   : > { %p1087_p5 = scmp.ge.s32.totalorder %s801_s21, 2  ;;  %s452_s8 = scalar_lea.sflag [#allocation4], %s451_s13 }
  0xf7   : > { %p623_p7 = pnand %p1087_p5, %p1086_p4 }
  0xf9   : > { %780 = dma.done.wait (!%p623_p7), %s452_s8, 512  }
  0xfa   : > { %782 = vsyncadd (!%p623_p7), %s452_s8, 4294966784  ;;  %s461_s30 = scalar_lea.sflag [#allocation7], %s451_s13 }
  0xfb   : > { %784 = dma.done.wait (!%p623_p7), %s461_s30, 512  }
  0xfc   : > { %786 = vsyncadd (!%p623_p7), %s461_s30, 4294966784  ;;  %p22_p12 = scmp.ge.s32.totalorder %s867_s24, 4   ;;  %s1088_s18 = smov %s793_s19 }
  0xfd   : > { %s1089_s19 = smov %s797_s20  ;;  %s1090_s20 = smov %s879_s27 }
  0xfe   : > { %s1091_s21 = smov %s867_s24  ;;  %24 = sbr.rel (!%p22_p12) target bundleno = 7 (0x7), region = 107 }
 0x105   :  { %466 = vsyncpa [#allocation3], 1 }
 0x106   :  { %468 = vsyncpa [#allocation3 + $0x1], 1 }
 0x107   :  { %469 = vsyncpa [#allocation4], 1 }
 0x108   :  { %471 = vsyncpa [#allocation4 + $0x1], 1 }
 0x109   :  { %472 = vsyncpa [#allocation7], 1 }
 0x10a   :  { %474 = vsyncpa [#allocation7 + $0x1], 1 }

</bundles_post_ra>
